<compile_context>
chip_gen: v5e
topology: v5e:2x2
jax: 0.10.0
libtpu: 0.0.40
codegen_flags: <defaults>
</compile_context>

<pallas_src>
import functools

import jax
import jax.numpy as jnp
from jax.experimental import pallas as pl
from jax.experimental.pallas import tpu as pltpu

LANES = 128
SUBLANES = 8
DEFAULT_BLOCK_ROWS = 4096   # (4096, 128) f32 = 2 MiB per input per buffer
UNROLL = 4


def sigmoid_eup(x):
    """Sigmoid written so its transcendental lands on the (otherwise idle) EUP."""
    return 0.5 * (jnp.tanh(0.5 * x) + 1.0)


def _iou_partial_kernel(x_ref, t_ref, out_ref, *, activation_fn, block_rows,
                        ragged, valid_rows_last):
    """One grid step: reduce a (block_rows, 128) tile into per-(sublane, lane)
    partial sums.  Output block (1, 2, 8, 128): [:,0]=sum(x*t), [:,1]=sum(x+t)."""

    def load_chunk(j):
        r = pl.multiple_of(j * SUBLANES, SUBLANES)
        xb = activation_fn(x_ref[pl.ds(r, SUBLANES), :].astype(jnp.float32))
        tb = t_ref[pl.ds(r, SUBLANES), :].astype(jnp.float32)
        return xb, tb

    def body_fast(j, carry):
        inter, total = carry
        xb, tb = load_chunk(j)
        return inter + xb * tb, total + (xb + tb)

    zeros = jnp.zeros((SUBLANES, LANES), jnp.float32)
    nb = block_rows // SUBLANES  # static

    def run_fast():
        inter, total = jax.lax.fori_loop(0, nb, body_fast, (zeros, zeros),
                                         unroll=min(UNROLL, nb))
        out_ref[0, 0, :, :] = inter
        out_ref[0, 1, :, :] = total

    if not ragged:
        run_fast()
        return

    i = pl.program_id(0)
    last = pl.num_programs(0) - 1

    @pl.when(i != last)
    def _():
        run_fast()

    @pl.when(i == last)
    def _():
        # Only the last tile has a ragged row remainder.  Loop just over the
        # chunks that contain valid rows and SELECT (not multiply) away rows
        # >= valid_rows_last, whose VMEM contents the DMA never wrote.
        nb_last = pl.cdiv(valid_rows_last, SUBLANES)  # static

        def body_masked(j, carry):
            inter, total = carry
            xb, tb = load_chunk(j)
            row = (jax.lax.broadcasted_iota(jnp.int32, (SUBLANES, LANES), 0)
                   + j * SUBLANES)
            valid = row < valid_rows_last
            xb = jnp.where(valid, xb, 0.0)
            tb = jnp.where(valid, tb, 0.0)
            return inter + xb * tb, total + (xb + tb)

        inter, total = jax.lax.fori_loop(0, nb_last, body_masked, (zeros, zeros),
                                         unroll=min(UNROLL, nb_last))
        out_ref[0, 0, :, :] = inter
        out_ref[0, 1, :, :] = total


def iou_loss(inputs, targets, activation_fn=sigmoid_eup, smooth=1.0,
             block_rows=DEFAULT_BLOCK_ROWS):
    """Pallas implementation of IoULoss.forward(inputs, targets, activation_fn, smooth)."""
    smooth = float(smooth)  # Python scalar; never capture a traced f32[] in the kernel

    x = jnp.reshape(inputs, (-1,))
    t = jnp.reshape(targets, (-1,))
    n = x.shape[0]

    # Pad the flat length to a lane multiple (and at least one vreg worth of
    # rows).  The padding is zeros and is corrected analytically below, so no
    # per-element mask is ever needed.  For n % 128 == 0 (typical NCHW masks)
    # there is no pad and the reshape is a free view.
    n_pad = max(pl.cdiv(n, LANES) * LANES, SUBLANES * LANES)
    pad = n_pad - n
    if pad:
        x = jnp.pad(x, (0, pad))
        t = jnp.pad(t, (0, pad))
    rows = n_pad // LANES                                  # >= 8

    # Keep block_rows a multiple of 8; any ragged row remainder goes to a
    # pl.when-gated masked last tile.
    block_rows = max(SUBLANES, (min(block_rows, rows) // SUBLANES) * SUBLANES)
    num_tiles = pl.cdiv(rows, block_rows)
    ragged = (rows % block_rows) != 0
    valid_rows_last = rows - (num_tiles - 1) * block_rows

    x2 = x.reshape(rows, LANES)
    t2 = t.reshape(rows, LANES)

    kernel = functools.partial(
        _iou_partial_kernel,
        activation_fn=activation_fn,
        block_rows=block_rows,
        ragged=ragged,
        valid_rows_last=valid_rows_last,
    )

    partials = pl.pallas_call(
        kernel,
        out_shape=jax.ShapeDtypeStruct((num_tiles, 2, SUBLANES, LANES),
                                       jnp.float32),
        grid=(num_tiles,),
        in_specs=[
            pl.BlockSpec((block_rows, LANES), lambda i: (i, 0)),
            pl.BlockSpec((block_rows, LANES), lambda i: (i, 0)),
        ],
        out_specs=pl.BlockSpec((1, 2, SUBLANES, LANES), lambda i: (i, 0, 0, 0)),
        compiler_params=pltpu.CompilerParams(
            # Independent steps -> v7x's two TensorCores may shard the grid.
            dimension_semantics=("parallel",),
            # 2 inputs x 2 buffers x 2 MiB = 8 MiB of streamed input + tiny
            # outputs; 32 MiB is safe headroom on v5e/v6e/v7x alike.
            vmem_limit_bytes=32 * 1024 * 1024,
        ),
    )(x2, t2)

    # Tiny (KB-scale) final reduction + IoU math on the partials.
    intersection = jnp.sum(partials[:, 0])
    total = jnp.sum(partials[:, 1])
    if pad:
        # Padded elements are zero in both tensors: they contribute nothing to
        # the intersection (activation(0) * 0) and activation(0) each to total.
        total = total - pad * activation_fn(jnp.zeros((), jnp.float32))
    union = total - intersection
    iou = (intersection + smooth) / (union + smooth)
    return 1.0 - iou


def _reference_iou_loss(inputs, targets, activation_fn, smooth=1.0):
    x = activation_fn(inputs).reshape(-1).astype(jnp.float32)
    t = targets.reshape(-1).astype(jnp.float32)
    intersection = jnp.sum(x * t)
    total = jnp.sum(x + t)
    union = total - intersection
    return 1.0 - (intersection + smooth) / (union + smooth)


if __name__ == "__main__":
    key = jax.random.PRNGKey(0)
    k1, k2, k3, k4, k5, k6 = jax.random.split(key, 6)

    # 1) NCHW logit / binary-mask pair, n % 128 == 0 (no pad copy), user
    #    activation passed through (jax.nn.sigmoid).
    B, C, H, W = 2, 4, 16, 16
    logits = jax.random.normal(k1, (B, C, H, W), dtype=jnp.float32)
    masks = (jax.random.uniform(k2, (B, C, H, W)) > 0.5).astype(jnp.float32)
    loss = jax.block_until_ready(iou_loss(logits, masks, jax.nn.sigmoid, smooth=1.0))
    ref = jax.block_until_ready(_reference_iou_loss(logits, masks, jax.nn.sigmoid, 1.0))
    assert jnp.allclose(loss, ref, rtol=1e-5, atol=1e-5), (loss, ref)

    # 2) Ragged n (not a multiple of 128): exercises zero-padding plus the
    #    analytic wrapper correction, with the default EUP sigmoid.
    logits2 = jax.random.normal(k3, (3, 1, 9, 13), dtype=jnp.float32)
    masks2 = (jax.random.uniform(k4, (3, 1, 9, 13)) > 0.5).astype(jnp.float32)
    loss2 = jax.block_until_ready(iou_loss(logits2, masks2, smooth=1.0))
    ref2 = jax.block_until_ready(_reference_iou_loss(logits2, masks2, sigmoid_eup, 1.0))
    assert jnp.allclose(loss2, ref2, rtol=1e-5, atol=1e-5), (loss2, ref2)

    # 3) Multi-tile grid with a ragged last tile (rows=18 -> block_rows=16,
    #    2 tiles, 2 valid rows in the last): exercises the pl.when-gated
    #    masked last grid step.
    logits3 = jax.random.normal(k5, (1, 1, 18, 128), dtype=jnp.float32)
    masks3 = (jax.random.uniform(k6, (1, 1, 18, 128)) > 0.5).astype(jnp.float32)
    loss3 = jax.block_until_ready(iou_loss(logits3, masks3, smooth=1.0))
    ref3 = jax.block_until_ready(_reference_iou_loss(logits3, masks3, sigmoid_eup, 1.0))
    assert jnp.allclose(loss3, ref3, rtol=1e-5, atol=1e-5), (loss3, ref3)

    print("KERNEL_OK")
</pallas_src>

<mosaic_0001>
module attributes {stable_mosaic.version = 11 : i64} {
  func.func @_iou_partial_kernel(%arg0: i32, %arg1: memref<16x128xf32, #tpu.memory_space<vmem>>, %arg2: memref<16x128xf32, #tpu.memory_space<vmem>>, %arg3: memref<1x2x8x128xf32, #tpu.memory_space<vmem>>) attributes {dimension_semantics = [#tpu.dimension_semantics<parallel>], iteration_bounds = array<i64: 1>, scalar_prefetch = 0 : i64, scratch_operands = 0 : i64, tpu.core_type = #tpu.core_type<tc>, window_params = [{transform_indices = @transform_0, window_bounds = array<i64: 16, 128>}, {transform_indices = @transform_1, window_bounds = array<i64: 16, 128>}, {transform_indices = @transform_2, window_bounds = array<i64: 1, 2, 8, 128>}]} {
    %cst = arith.constant 0.000000e+00 : f32
    %0 = vector.broadcast %cst : f32 to vector<8x128xf32>
    %c0_i32 = arith.constant 0 : i32
    %c8_i32 = arith.constant 8 : i32
    %1 = arith.muli %c0_i32, %c8_i32 : i32
    %2 = tpu.assume_multiple %1, 8 : i32
    %3 = arith.index_cast %2 : i32 to index
    %c0 = arith.constant 0 : index
    %4 = vector.load %arg1[%3, %c0] : memref<16x128xf32, #tpu.memory_space<vmem>>, vector<8x128xf32>
    %5 = arith.negf %4 : vector<8x128xf32>
    %6 = math.exp %5 : vector<8x128xf32>
    %cst_0 = arith.constant 1.000000e+00 : f32
    %7 = vector.broadcast %cst_0 : f32 to vector<8x128xf32>
    %8 = arith.addf %7, %6 : vector<8x128xf32>
    %9 = arith.divf %7, %8 : vector<8x128xf32>
    %10 = arith.index_cast %2 : i32 to index
    %c0_1 = arith.constant 0 : index
    %11 = vector.load %arg2[%10, %c0_1] : memref<16x128xf32, #tpu.memory_space<vmem>>, vector<8x128xf32>
    %12 = arith.mulf %9, %11 : vector<8x128xf32>
    %13 = arith.addf %0, %12 : vector<8x128xf32>
    %14 = arith.addf %9, %11 : vector<8x128xf32>
    %15 = arith.addf %0, %14 : vector<8x128xf32>
    %c1_i32 = arith.constant 1 : i32
    %c8_i32_2 = arith.constant 8 : i32
    %16 = arith.muli %c1_i32, %c8_i32_2 : i32
    %17 = tpu.assume_multiple %16, 8 : i32
    %18 = arith.index_cast %17 : i32 to index
    %c0_3 = arith.constant 0 : index
    %19 = vector.load %arg1[%18, %c0_3] : memref<16x128xf32, #tpu.memory_space<vmem>>, vector<8x128xf32>
    %20 = arith.negf %19 : vector<8x128xf32>
    %21 = math.exp %20 : vector<8x128xf32>
    %cst_4 = arith.constant 1.000000e+00 : f32
    %22 = vector.broadcast %cst_4 : f32 to vector<8x128xf32>
    %23 = arith.addf %22, %21 : vector<8x128xf32>
    %24 = arith.divf %22, %23 : vector<8x128xf32>
    %25 = arith.index_cast %17 : i32 to index
    %c0_5 = arith.constant 0 : index
    %26 = vector.load %arg2[%25, %c0_5] : memref<16x128xf32, #tpu.memory_space<vmem>>, vector<8x128xf32>
    %27 = arith.mulf %24, %26 : vector<8x128xf32>
    %28 = arith.addf %13, %27 : vector<8x128xf32>
    %29 = arith.addf %24, %26 : vector<8x128xf32>
    %30 = arith.addf %15, %29 : vector<8x128xf32>
    %c2_i32 = arith.constant 2 : i32
    %c0_6 = arith.constant 0 : index
    %c0_7 = arith.constant 0 : index
    %c0_8 = arith.constant 0 : index
    %c0_9 = arith.constant 0 : index
    %31 = vector.load %arg3[%c0_6, %c0_7, %c0_8, %c0_9] : memref<1x2x8x128xf32, #tpu.memory_space<vmem>>, vector<1x1x8x128xf32>
    %32 = vector.shape_cast %31 : vector<1x1x8x128xf32> to vector<8x128xf32>
    %33 = vector.shape_cast %28 : vector<8x128xf32> to vector<1x1x8x128xf32>
    tpu.vector_store %arg3[%c0_6, %c0_7, %c0_8, %c0_9], %33 {strides = array<i32>} : memref<1x2x8x128xf32, #tpu.memory_space<vmem>>, vector<1x1x8x128xf32>,
    %c0_10 = arith.constant 0 : index
    %c1 = arith.constant 1 : index
    %c0_11 = arith.constant 0 : index
    %c0_12 = arith.constant 0 : index
    %34 = vector.load %arg3[%c0_10, %c1, %c0_11, %c0_12] : memref<1x2x8x128xf32, #tpu.memory_space<vmem>>, vector<1x1x8x128xf32>
    %35 = vector.shape_cast %34 : vector<1x1x8x128xf32> to vector<8x128xf32>
    %36 = vector.shape_cast %30 : vector<8x128xf32> to vector<1x1x8x128xf32>
    tpu.vector_store %arg3[%c0_10, %c1, %c0_11, %c0_12], %36 {strides = array<i32>} : memref<1x2x8x128xf32, #tpu.memory_space<vmem>>, vector<1x1x8x128xf32>,
    return
  }
  func.func @transform_0(%arg0: i32) -> (i32, i32) {
    %c0_i32 = arith.constant 0 : i32
    %c0_i32_0 = arith.constant 0 : i32
    return %arg0, %c0_i32 : i32, i32
  }
  func.func @transform_1(%arg0: i32) -> (i32, i32) {
    %c0_i32 = arith.constant 0 : i32
    %c0_i32_0 = arith.constant 0 : i32
    return %arg0, %c0_i32 : i32, i32
  }
  func.func @transform_2(%arg0: i32) -> (i32, i32, i32, i32) {
    %c0_i32 = arith.constant 0 : i32
    %c0_i32_0 = arith.constant 0 : i32
    %c0_i32_1 = arith.constant 0 : i32
    %c0_i32_2 = arith.constant 0 : i32
    return %arg0, %c0_i32, %c0_i32_0, %c0_i32_1 : i32, i32, i32, i32
  }
}

</mosaic_0001>

<bundles_post_ra>
// kernel: tpu_custom_call.1
= control target key start
LH: loop header
LB: loop body
LE: loop exit
PB: predicated region body
PF: predicated region fallthrough
CT: control target
= control target key end

     0   :  { %7 = vsyncpa [#allocation3], 0  ;;  %s250_s0 = inlined_call_operand.hbm [shape: f32[16,128], index: 0, kind: input, shape index: {}]   ;;  %s251_s1 = inlined_call_operand.hbm [shape: f32[16,128], index: 1, kind: input, shape index: {}]   ;;  %s252_s2 = inlined_call_operand.hbm [shape: f32[1,2,8,128], index: 2, kind: output, shape index: {}]  }
   0x1   :  { %8 = vsyncpa [#allocation6], 0 }
   0x2   :  { %9 = vsyncpa [#allocation4], 0  ;;  %s14_s11 = sshll.u32 %s250_s0, 4  ;;  %s212_s12 = smov [#allocation2]   ;;  %s15_s11 = int_to_ptr.hbm [resolvable:$true] %s14_s11 }
   0x3   :  { %s16_s13 = sshll.u32 %s212_s12, 4  ;;  %s27_s16 = sshll.u32 %s251_s1, 4  ;;  %s17_s13 = int_to_ptr.vmem [resolvable:$true] %s16_s13  ;;  %s28_s16 = int_to_ptr.hbm [resolvable:$true] %s27_s16 }
   0x4   :  { %s213_s17 = smov 128   ;;  %s214_s18 = smov 8  }
   0x5   :  { %22 = dma.hbm_to_vmem [thread:$0]  %s15_s11, 256, %s17_s13, [#allocation3], %s213_s17, %s213_s17, %s214_s18  }
   0x6   :  { %s215_s19 = smov [#allocation5]  }
   0x7   :  { %s29_s20 = sshll.u32 %s215_s19, 4  ;;  %s30_s20 = int_to_ptr.vmem [resolvable:$true] %s29_s20 }
   0x8   :  { %35 = dma.hbm_to_vmem [thread:$0]  %s28_s16, 256, %s30_s20, [#allocation6], %s213_s17, %s213_s17, %s214_s18  }
   0x9   :  { %206 = dma.done.wait [#allocation3], 256  }
   0xa   :  { %207 = vsyncadd [#allocation3], 4294967040 }
   0xb   :  { %208 = dma.done.wait [#allocation6], 256  }
   0xc   :  { %209 = vsyncadd [#allocation6], 4294967040  ;;  %v44_v0 = vld [vmem:[#allocation2] sm:$0xff]  ;;  %v70_v1 = vld [vmem:[#allocation2 + $0x8] sm:$0xff]  ;;  %s216_s0 = smov [#allocation7]   ;;  %s105_s23 = sshll.u32 %s252_s2, 4  ;;  %s106_s23 = int_to_ptr.hbm [resolvable:$true] %s105_s23 }
   0xd   :  { %v119_v2 = vmul.f32 -1.442695, %v44_v0  ;;  %v120_v3 = vmul.f32 -1.442695, %v70_v1  ;;  %v64_v23 = vld [vmem:[#allocation5] sm:$0xff]  ;;  %v91_v26 = vld [vmem:[#allocation5 + $0x8] sm:$0xff] }
   0xe   :  { %s103_s1 = sshll.u32 %s216_s0, 4  ;;  %s104_s1 = int_to_ptr.vmem [resolvable:$true] %s103_s1 }
   0xf   :  { %126 = vpow2.f32 %v119_v2 }
  0x10   :  { %128 = vpow2.f32 %v120_v3 }
  0x15   :  { %v127_v4 = vpop.eup %126 }
  0x16   :  { %v129_v5 = vpop.eup %128  ;;  %v48_v6 = vadd.f32 1.0, %v127_v4 }
  0x17   :  { %v74_v7 = vadd.f32 1.0, %v129_v5 }
  0x18   :  { %130 = vrcp.f32 %v48_v6  ;;  %vm54_vm0 = vweird.f32 %v48_v6  ;;  %v60_v11 = vand.u32 2147483648, %v48_v6  ;;  %v58_v14 = vand.u32 2147483647, %v48_v6 }
  0x19   :  { %132 = vrcp.f32 %v74_v7  ;;  %v86_v15 = vand.u32 2147483648, %v74_v7  ;;  %vm80_vm2 = vweird.f32 %v74_v7  ;;  %v84_v17 = vand.u32 2147483647, %v74_v7 }
  0x1a   :  { %v61_v19 = vor.u32 1.1754944e-38, %v60_v11  ;;  %vm59_vm5 = vcmp.eq.f32.partialorder %v58_v14, 8.507059e+37 }
  0x1b   :  { %v87_v22 = vor.u32 1.1754944e-38, %v86_v15  ;;  %vm85_vm7 = vcmp.eq.f32.partialorder %v84_v17, 8.507059e+37 }
  0x1e   :  { %v131_v8 = vpop.eup %130 }
  0x1f   :  { %v133_v9 = vpop.eup %132  ;;  %v50_v10 = vmul.f32 %v131_v8, %v48_v6  ;;  %vm55_vm1 = vweird.f32 %v131_v8 }
  0x20   :  { %v76_v12 = vmul.f32 %v133_v9, %v74_v7  ;;  %vm81_vm3 = vweird.f32 %v133_v9  ;;  %vm56_vm4 = vmor %vm54_vm0, %vm55_vm1 }
  0x21   :  { %v51_v13 = vsub.f32 1.0, %v50_v10  ;;  %vm82_vm6 = vmor %vm80_vm2, %vm81_vm3 }
  0x22   :  { %v77_v16 = vsub.f32 1.0, %v76_v12 }
  0x23   :  { %v52_v18 = vmul.f32 %v131_v8, %v51_v13 }
  0x24   :  { %v78_v20 = vmul.f32 %v133_v9, %v77_v16 }
  0x25   :  { %v53_v21 = vadd.f32 %v131_v8, %v52_v18 }
  0x26   :  { %v79_v24 = vadd.f32 %v133_v9, %v78_v20 }
  0x27   :  { %v57_v25 = vsel %vm56_vm4, %v131_v8, %v53_v21 }
  0x28   :  { %v62_v27 = vsel %vm59_vm5, %v61_v19, %v57_v25  ;;  %v83_v28 = vsel %vm82_vm6, %v133_v9, %v79_v24 }
  0x29   :  { %v65_v29 = vmul.f32 %v64_v23, %v62_v27  ;;  %v88_v30 = vsel %vm85_vm7, %v87_v22, %v83_v28  ;;  %v67_v31 = vadd.f32 %v64_v23, %v62_v27 }
  0x2a   :  { %v92_v32 = vmul.f32 %v91_v26, %v88_v30  ;;  %v94_v33 = vadd.f32 %v91_v26, %v88_v30 }
  0x2c   :  { %v93_v34 = vadd.f32 %v92_v32, %v65_v29  ;;  %v95_v35 = vadd.f32 %v94_v33, %v67_v31 }
  0x2e   :  { %96 = vst [vmem:[#allocation7] sm:$0xff] %v93_v34 }
  0x2f   :  { %98 = vst [vmem:[#allocation7 + $0x8] sm:$0xff] %v95_v35 }
  0x30   :  { %111 = dma.vmem_to_hbm [thread:$0]  %s104_s1, 256, %s106_s23, [#allocation4], %s213_s17, %s213_s17, %s214_s18  }
  0x31   :  { %210 = dma.done.wait [#allocation4], 256  }
  0x32   :  { %211 = vsyncadd [#allocation4], 4294967040 }
  0x33   :  { %116 = vsyncpa [#allocation3], 1 }
  0x34   :  { %117 = vsyncpa [#allocation6], 1 }
  0x35   :  { %118 = vsyncpa [#allocation4], 1 }

</bundles_post_ra>
